<compile_context>
chip_gen: v7x
topology: tpu7x:2x2x1
jax: 0.10.0
libtpu: 0.0.40
codegen_flags: <defaults>
</compile_context>

<pallas_src>
import functools

import numpy as np
import jax
import jax.numpy as jnp
from jax import lax
from jax.experimental import pallas as pl
from jax.experimental.pallas import tpu as pltpu


def _largest_divisor_leq(n, cap):
    cap = max(1, min(n, int(cap)))
    for d in range(cap, 0, -1):
        if n % d == 0:
            return d
    return 1


def _pick_q_tile(n, cap=512):
    if n <= cap:
        return n
    best = None
    for d in range(cap, 0, -1):
        if n % d == 0:
            if d % 8 == 0:          # keep the sublane dim aligned when tiling
                return d
            if best is None:
                best = d
    return best or n


def _mha_kernel(x_ref, wq_ref, wk_ref, wv_ref, wp_ref, bp_ref,
                out_ref, attn_ref, acc_ref, *,
                G, Dh, TQ, N, compute_dtype, weights_resident):
    # x_ref:    (1, N, E)        tokens, already compute_dtype
    # wq/wk/wv: (HG, E, G*Dh)    resident  -- or (1, E, G*Dh) streamed
    # wp_ref:   (HG, G*Dh, E)    resident  -- or (1, G*Dh, E) streamed
    # bp_ref:   (1, E)           f32 projection bias
    # out_ref:  (1, TQ, E)       output block (revisited across head groups)
    # attn_ref: (1, G, TQ, N)    attention weights for this (b, head-group, q-tile)
    # acc_ref:  (TQ, E) f32      head-group-summed projection accumulator
    qi = pl.program_id(1)
    hg = pl.program_id(2)
    n_hg = pl.num_programs(2)

    widx = hg if weights_resident else 0
    wq = wq_ref[widx]                                   # (E, G*Dh)
    wk = wk_ref[widx]
    wv = wv_ref[widx]
    wp = wp_ref[widx]                                   # (G*Dh, E)

    x_view = x_ref.at[0]                                # (N, E) ref view
    x = x_view[...]                                     # full rows for K / V
    if TQ == N:
        xq = x
    else:
        start = pl.multiple_of(qi * TQ, TQ)
        xq = x_view[pl.ds(start, TQ), :]                # (TQ, E) query rows

    # Grouped projections: wide MXU matmuls, f32 accumulation.
    # The softmax scale is folded into wq by the wrapper.
    q = jnp.dot(xq, wq, preferred_element_type=jnp.float32)   # (TQ, G*Dh)
    k = jnp.dot(x, wk, preferred_element_type=jnp.float32)    # (N,  G*Dh)
    v = jnp.dot(x, wv, preferred_element_type=jnp.float32)    # (N,  G*Dh)

    outs = []
    for g in range(G):                                  # static unroll over heads
        sl = slice(g * Dh, (g + 1) * Dh)
        qg = q[:, sl].astype(compute_dtype)
        kg = k[:, sl].astype(compute_dtype)
        vg = v[:, sl].astype(compute_dtype)

        # Scores: contract last dims of q and k -> no materialized k.T.
        s = lax.dot_general(qg, kg, (((1,), (1,)), ((), ())),
                            preferred_element_type=jnp.float32)      # (TQ, N)

        # Numerically-stable softmax in f32; exact reciprocal so stored
        # attention weights sum to 1.
        s = s - jnp.max(s, axis=-1, keepdims=True)
        e = jnp.exp(s)
        p = e * pl.reciprocal(jnp.sum(e, axis=-1, keepdims=True))

        # Lane-dense (TQ, N) store of this head's attention weights.
        attn_ref[0, g] = p.astype(attn_ref.dtype)

        # attention_dropout(p=0.0) is identity.
        outs.append(jnp.dot(p.astype(compute_dtype), vg,
                            preferred_element_type=jnp.float32))     # (TQ, Dh)

    # Head-concat inside the group, then one deep-contraction output matmul.
    o_grp = outs[0] if G == 1 else jnp.concatenate(outs, axis=-1)     # (TQ, G*Dh)
    y = jnp.dot(o_grp.astype(compute_dtype), wp,
                preferred_element_type=jnp.float32)                   # (TQ, E)

    @pl.when(hg == 0)
    def _init():
        acc_ref[...] = y + bp_ref[...]

    @pl.when(hg != 0)
    def _accum():
        acc_ref[...] += y

    @pl.when(hg == n_hg - 1)
    def _finish():
        # dropout(p=0.0) is identity.
        out_ref[0] = acc_ref[...].astype(out_ref.dtype)


def multi_head_attention(x, w_qkv_t, w_proj_t, b_proj, *, num_heads,
                         compute_dtype=jnp.bfloat16,
                         attn_dtype=jnp.bfloat16,
                         mxu_lanes=256, q_tile=None):
    """x: [B, N, E]; w_qkv_t: [E, 3E]; w_proj_t: [E, E]; b_proj: [E]."""
    B, N, E = x.shape
    H = num_heads
    assert E % H == 0
    Dh = E // H
    scale = float(Dh) ** (-0.5)

    # Head-group size targets the MXU output width (256 lanes v6e/v7x,
    # use mxu_lanes=128 on v5e).
    G = _largest_divisor_leq(H, max(1, mxu_lanes // Dh))
    HG = H // G
    GDh = G * Dh

    # Query tiling bounds per-step VMEM (v7x 64 MiB) and adds a parallel axis.
    TQ = q_tile if q_tile is not None else _pick_q_tile(N)
    assert N % TQ == 0
    QT = N // TQ

    # ---- one-time parameter prep (f32 math, then cast) ----
    def group(w):                        # (E, E), cols head-major -> (HG, E, G*Dh)
        return w.reshape(E, HG, GDh).transpose(1, 0, 2)

    wq = group(w_qkv_t[:, 0 * E:1 * E] * scale).astype(compute_dtype)  # scale folded
    wk = group(w_qkv_t[:, 1 * E:2 * E]).astype(compute_dtype)
    wv = group(w_qkv_t[:, 2 * E:3 * E]).astype(compute_dtype)
    wp = w_proj_t.reshape(HG, GDh, E).astype(compute_dtype)            # head-major rows
    bp = b_proj.reshape(1, E).astype(jnp.float32)
    xc = x.astype(compute_dtype)          # halve the x HBM read, drop in-kernel cast

    csize = np.dtype(jnp.dtype(compute_dtype)).itemsize
    xsize = np.dtype(x.dtype).itemsize
    asize = np.dtype(jnp.dtype(attn_dtype)).itemsize

    # Hold all weights resident in VMEM for the whole grid when they fit.
    weights_bytes = 4 * E * E * csize
    weights_resident = weights_bytes <= (16 << 20)

    if weights_resident:
        wq_spec = pl.BlockSpec((HG, E, GDh), lambda b, qi, hg: (0, 0, 0))
        wk_spec = pl.BlockSpec((HG, E, GDh), lambda b, qi, hg: (0, 0, 0))
        wv_spec = pl.BlockSpec((HG, E, GDh), lambda b, qi, hg: (0, 0, 0))
        wp_spec = pl.BlockSpec((HG, GDh, E), lambda b, qi, hg: (0, 0, 0))
    else:
        # Large-E fallback: stream one head-group slab per step.
        wq_spec = pl.BlockSpec((1, E, GDh), lambda b, qi, hg: (hg, 0, 0))
        wk_spec = pl.BlockSpec((1, E, GDh), lambda b, qi, hg: (hg, 0, 0))
        wv_spec = pl.BlockSpec((1, E, GDh), lambda b, qi, hg: (hg, 0, 0))
        wp_spec = pl.BlockSpec((1, GDh, E), lambda b, qi, hg: (hg, 0, 0))

    kernel = functools.partial(
        _mha_kernel, G=G, Dh=Dh, TQ=TQ, N=N,
        compute_dtype=compute_dtype, weights_resident=weights_resident)

    grid_spec = pltpu.PrefetchScalarGridSpec(
        num_scalar_prefetch=0,
        grid=(B, QT, HG),                         # head-group axis last (reduction)
        in_specs=[
            pl.BlockSpec((1, N, E), lambda b, qi, hg: (b, 0, 0)),   # x (resident per b)
            wq_spec, wk_spec, wv_spec, wp_spec,
            pl.BlockSpec((1, E), lambda b, qi, hg: (0, 0)),         # bias
        ],
        out_specs=(
            pl.BlockSpec((1, TQ, E), lambda b, qi, hg: (b, qi, 0)),         # out
            pl.BlockSpec((1, G, TQ, N), lambda b, qi, hg: (b, hg, qi, 0)),  # attn
        ),
        scratch_shapes=[pltpu.VMEM((TQ, E), jnp.float32)],
    )

    out_shape = (
        jax.ShapeDtypeStruct((B, N, E), x.dtype),
        jax.ShapeDtypeStruct((B, H, N, N), attn_dtype),
    )

    # ---- VMEM budget (includes N*N f32 intermediates; capped below capacity) ----
    try:
        vmem_cap = int(pltpu.get_tpu_info().vmem_capacity_bytes)
    except Exception:
        vmem_cap = 64 << 20                       # conservative (v7x)

    res_w = weights_bytes if weights_resident else 2 * 4 * E * GDh * csize
    per_step = (2 * N * E * csize                 # x block (double-buffered)
                + 2 * G * TQ * N * asize          # attn output block
                + 2 * TQ * E * xsize              # out block
                + 2 * E * 4                       # bias
                + TQ * E * 4                      # acc scratch
                + (TQ + 2 * N) * GDh * 4          # q / k / v f32
                + 3 * TQ * N * 4                  # scores / exp / probs f32
                + 2 * TQ * GDh * 4                # per-head outs + concat
                + 2 * TQ * E * 4)                 # projected y
    vmem_bytes = res_w + per_step + (4 << 20)
    vmem_bytes = max(vmem_bytes, 32 << 20)
    vmem_bytes = int(min(vmem_bytes, max(vmem_cap - (8 << 20), 16 << 20)))

    steps = B * QT * HG
    flops_per_step = 2 * (TQ * E * GDh            # Q projection
                          + 2 * N * E * GDh       # K, V projections
                          + 2 * G * TQ * N * Dh   # scores + PV
                          + TQ * GDh * E)         # output projection
    cost = pl.CostEstimate(
        flops=int(steps * flops_per_step),
        transcendentals=int(B * H * N * N),
        bytes_accessed=int(B * N * E * csize + 4 * E * E * csize + E * 4
                           + B * N * E * xsize + B * H * N * N * asize),
    )

    return pl.pallas_call(
        kernel,
        out_shape=out_shape,
        grid_spec=grid_spec,
        compiler_params=pltpu.CompilerParams(
            dimension_semantics=("parallel", "parallel", "arbitrary"),
            vmem_limit_bytes=vmem_bytes),
        cost_estimate=cost,
    )(xc, wq, wk, wv, wp, bp)


def _reference(x, w_qkv_t, w_proj_t, b_proj, *, num_heads):
    # Pure-JAX f32 reference mirroring the PyTorch forward.
    B, N, E = x.shape
    head_dim = E // num_heads
    scale = float(head_dim) ** (-0.5)
    qkv = x @ w_qkv_t                                          # (B, N, 3E)
    q, k, v = jnp.split(qkv, 3, axis=-1)

    def to_heads(t):
        return t.reshape(B, N, num_heads, head_dim).transpose(0, 2, 1, 3)

    q, k, v = map(to_heads, (q, k, v))                         # (B, H, N, Dh)
    attn = scale * jnp.einsum("bhnd,bhmd->bhnm", q, k)
    attn = jax.nn.softmax(attn, axis=-1)
    o = jnp.einsum("bhnm,bhmd->bhnd", attn, v)                 # (B, H, N, Dh)
    o = o.transpose(0, 2, 1, 3).reshape(B, N, E)
    out = o @ w_proj_t + b_proj
    return out, attn


if __name__ == "__main__":
    B, N, E, H = 2, 8, 32, 4

    key = jax.random.PRNGKey(0)
    kx, kqkv, kproj, kb = jax.random.split(key, 4)

    x = jax.random.normal(kx, (B, N, E), dtype=jnp.float32)
    # Deterministic synthetic parameters (not a checkpoint load).
    w_qkv_t = jax.random.normal(kqkv, (E, 3 * E), dtype=jnp.float32) * 0.05
    w_proj_t = jax.random.normal(kproj, (E, E), dtype=jnp.float32) * 0.05
    b_proj = jax.random.normal(kb, (E,), dtype=jnp.float32) * 0.05

    out, attn_w = multi_head_attention(x, w_qkv_t, w_proj_t, b_proj, num_heads=H)
    jax.block_until_ready((out, attn_w))

    out_ref, attn_ref = _reference(x, w_qkv_t, w_proj_t, b_proj, num_heads=H)
    assert out.shape == (B, N, E) and attn_w.shape == (B, H, N, N)
    # bf16 MXU operands / bf16 attn weights (f32 accumulation & softmax)
    # -> relaxed tolerance vs. the f32 reference.
    assert jnp.allclose(out, out_ref, atol=2e-2, rtol=2e-2)
    assert jnp.allclose(attn_w.astype(jnp.float32), attn_ref, atol=2e-2, rtol=2e-2)

    print("KERNEL_OK")
</pallas_src>

<mosaic_0001>
module attributes {stable_mosaic.version = 11 : i64} {
  func.func @_mha_kernel(%arg0: i32, %arg1: i32, %arg2: i32, %arg3: memref<1x8x32xbf16, #tpu.memory_space<vmem>>, %arg4: memref<1x32x32xbf16, #tpu.memory_space<vmem>>, %arg5: memref<1x32x32xbf16, #tpu.memory_space<vmem>>, %arg6: memref<1x32x32xbf16, #tpu.memory_space<vmem>>, %arg7: memref<1x32x32xbf16, #tpu.memory_space<vmem>>, %arg8: memref<1x32xf32, #tpu.memory_space<vmem>>, %arg9: memref<1x8x32xf32, #tpu.memory_space<vmem>>, %arg10: memref<1x4x8x8xbf16, #tpu.memory_space<vmem>>, %arg11: memref<8x32xf32, #tpu.memory_space<vmem>>) attributes {dimension_semantics = [#tpu.dimension_semantics<parallel>, #tpu.dimension_semantics<parallel>, #tpu.dimension_semantics<arbitrary>], iteration_bounds = array<i64: 2, 1, 1>, scalar_prefetch = 0 : i64, scratch_operands = 1 : i64, tpu.core_type = #tpu.core_type<tc>, window_params = [{transform_indices = @transform_0, window_bounds = array<i64: 1, 8, 32>}, {pipeline_mode = #tpu.pipeline_mode<synchronous>, transform_indices = @transform_1, window_bounds = array<i64: 1, 32, 32>}, {pipeline_mode = #tpu.pipeline_mode<synchronous>, transform_indices = @transform_2, window_bounds = array<i64: 1, 32, 32>}, {pipeline_mode = #tpu.pipeline_mode<synchronous>, transform_indices = @transform_3, window_bounds = array<i64: 1, 32, 32>}, {pipeline_mode = #tpu.pipeline_mode<synchronous>, transform_indices = @transform_4, window_bounds = array<i64: 1, 32, 32>}, {pipeline_mode = #tpu.pipeline_mode<synchronous>, transform_indices = @transform_5, window_bounds = array<i64: 1, 32>}, {transform_indices = @transform_6, window_bounds = array<i64: 1, 8, 32>}, {transform_indices = @transform_7, window_bounds = array<i64: 1, 4, 8, 8>}]} {
    %0 = arith.index_cast %arg2 : i32 to index
    %c0 = arith.constant 0 : index
    %c0_0 = arith.constant 0 : index
    %1 = vector.load %arg4[%0, %c0, %c0_0] : memref<1x32x32xbf16, #tpu.memory_space<vmem>>, vector<1x32x32xbf16>
    %2 = vector.shape_cast %1 : vector<1x32x32xbf16> to vector<32x32xbf16>
    %3 = arith.index_cast %arg2 : i32 to index
    %c0_1 = arith.constant 0 : index
    %c0_2 = arith.constant 0 : index
    %4 = vector.load %arg5[%3, %c0_1, %c0_2] : memref<1x32x32xbf16, #tpu.memory_space<vmem>>, vector<1x32x32xbf16>
    %5 = vector.shape_cast %4 : vector<1x32x32xbf16> to vector<32x32xbf16>
    %6 = arith.index_cast %arg2 : i32 to index
    %c0_3 = arith.constant 0 : index
    %c0_4 = arith.constant 0 : index
    %7 = vector.load %arg6[%6, %c0_3, %c0_4] : memref<1x32x32xbf16, #tpu.memory_space<vmem>>, vector<1x32x32xbf16>
    %8 = vector.shape_cast %7 : vector<1x32x32xbf16> to vector<32x32xbf16>
    %9 = arith.index_cast %arg2 : i32 to index
    %c0_5 = arith.constant 0 : index
    %c0_6 = arith.constant 0 : index
    %10 = vector.load %arg7[%9, %c0_5, %c0_6] : memref<1x32x32xbf16, #tpu.memory_space<vmem>>, vector<1x32x32xbf16>
    %11 = vector.shape_cast %10 : vector<1x32x32xbf16> to vector<32x32xbf16>
    %c0_7 = arith.constant 0 : index
    %c0_8 = arith.constant 0 : index
    %c0_9 = arith.constant 0 : index
    %12 = vector.load %arg3[%c0_7, %c0_8, %c0_9] : memref<1x8x32xbf16, #tpu.memory_space<vmem>>, vector<1x8x32xbf16>
    %13 = vector.shape_cast %12 : vector<1x8x32xbf16> to vector<8x32xbf16>
    %cst = arith.constant dense<0.000000e+00> : vector<8x32xf32>
    %14 = tpu.matmul %13, %2, %cst {dimension_numbers = #tpu.dot_dimension_numbers<[1], [0], [0], [1], [0, 0, 1, 1], [], []>} : vector<8x32xbf16>, vector<32x32xbf16>, vector<8x32xf32> -> vector<8x32xf32>
    %cst_10 = arith.constant dense<0.000000e+00> : vector<8x32xf32>
    %15 = tpu.matmul %13, %5, %cst_10 {dimension_numbers = #tpu.dot_dimension_numbers<[1], [0], [0], [1], [0, 0, 1, 1], [], []>} : vector<8x32xbf16>, vector<32x32xbf16>, vector<8x32xf32> -> vector<8x32xf32>
    %cst_11 = arith.constant dense<0.000000e+00> : vector<8x32xf32>
    %16 = tpu.matmul %13, %8, %cst_11 {dimension_numbers = #tpu.dot_dimension_numbers<[1], [0], [0], [1], [0, 0, 1, 1], [], []>} : vector<8x32xbf16>, vector<32x32xbf16>, vector<8x32xf32> -> vector<8x32xf32>
    %17 = vector.extract_strided_slice %14 {offsets = [0, 0], sizes = [8, 8], strides = [1, 1]} : vector<8x32xf32> to vector<8x8xf32>
    %18 = arith.truncf %17 : vector<8x8xf32> to vector<8x8xbf16>
    %19 = vector.extract_strided_slice %15 {offsets = [0, 0], sizes = [8, 8], strides = [1, 1]} : vector<8x32xf32> to vector<8x8xf32>
    %20 = arith.truncf %19 : vector<8x8xf32> to vector<8x8xbf16>
    %21 = vector.extract_strided_slice %16 {offsets = [0, 0], sizes = [8, 8], strides = [1, 1]} : vector<8x32xf32> to vector<8x8xf32>
    %22 = arith.truncf %21 : vector<8x8xf32> to vector<8x8xbf16>
    %cst_12 = arith.constant dense<0.000000e+00> : vector<8x8xf32>
    %23 = tpu.matmul %18, %20, %cst_12 {dimension_numbers = #tpu.dot_dimension_numbers<[1], [1], [0], [0], [0, 0, 1, 0], [], []>} : vector<8x8xbf16>, vector<8x8xbf16>, vector<8x8xf32> -> vector<8x8xf32>
    %cst_13 = arith.constant dense<0xFF800000> : vector<8xf32>
    %24 = vector.multi_reduction <maximumf>, %23, %cst_13 [1] : vector<8x8xf32> to vector<8xf32>
    %25 = vector.shape_cast %24 : vector<8xf32> to vector<8x1xf32>
    %26 = vector.broadcast %25 : vector<8x1xf32> to vector<8x8xf32>
    %27 = arith.subf %23, %26 : vector<8x8xf32>
    %28 = math.exp %27 : vector<8x8xf32>
    %cst_14 = arith.constant dense<0.000000e+00> : vector<8xf32>
    %29 = vector.multi_reduction <add>, %28, %cst_14 [1] : vector<8x8xf32> to vector<8xf32>
    %30 = vector.shape_cast %29 : vector<8xf32> to vector<8x1xf32>
    %31 = tpu.reciprocal %30 : vector<8x1xf32> -> vector<8x1xf32>
    %32 = vector.broadcast %31 : vector<8x1xf32> to vector<8x8xf32>
    %33 = arith.mulf %28, %32 : vector<8x8xf32>
    %34 = arith.truncf %33 : vector<8x8xf32> to vector<8x8xbf16>
    %c0_15 = arith.constant 0 : index
    %c0_16 = arith.constant 0 : index
    %c0_17 = arith.constant 0 : index
    %c0_18 = arith.constant 0 : index
    %35 = vector.load %arg10[%c0_15, %c0_16, %c0_17, %c0_18] : memref<1x4x8x8xbf16, #tpu.memory_space<vmem>>, vector<1x1x8x8xbf16>
    %36 = vector.shape_cast %35 : vector<1x1x8x8xbf16> to vector<8x8xbf16>
    %37 = vector.shape_cast %34 : vector<8x8xbf16> to vector<1x1x8x8xbf16>
    tpu.vector_store %arg10[%c0_15, %c0_16, %c0_17, %c0_18], %37 {strides = array<i32>} : memref<1x4x8x8xbf16, #tpu.memory_space<vmem>>, vector<1x1x8x8xbf16>,
    %38 = arith.truncf %33 : vector<8x8xf32> to vector<8x8xbf16>
    %cst_19 = arith.constant dense<0.000000e+00> : vector<8x8xf32>
    %39 = tpu.matmul %38, %22, %cst_19 {dimension_numbers = #tpu.dot_dimension_numbers<[1], [0], [0], [1], [0, 0, 1, 1], [], []>} : vector<8x8xbf16>, vector<8x8xbf16>, vector<8x8xf32> -> vector<8x8xf32>
    %40 = vector.extract_strided_slice %14 {offsets = [0, 8], sizes = [8, 8], strides = [1, 1]} : vector<8x32xf32> to vector<8x8xf32>
    %41 = arith.truncf %40 : vector<8x8xf32> to vector<8x8xbf16>
    %42 = vector.extract_strided_slice %15 {offsets = [0, 8], sizes = [8, 8], strides = [1, 1]} : vector<8x32xf32> to vector<8x8xf32>
    %43 = arith.truncf %42 : vector<8x8xf32> to vector<8x8xbf16>
    %44 = vector.extract_strided_slice %16 {offsets = [0, 8], sizes = [8, 8], strides = [1, 1]} : vector<8x32xf32> to vector<8x8xf32>
    %45 = arith.truncf %44 : vector<8x8xf32> to vector<8x8xbf16>
    %cst_20 = arith.constant dense<0.000000e+00> : vector<8x8xf32>
    %46 = tpu.matmul %41, %43, %cst_20 {dimension_numbers = #tpu.dot_dimension_numbers<[1], [1], [0], [0], [0, 0, 1, 0], [], []>} : vector<8x8xbf16>, vector<8x8xbf16>, vector<8x8xf32> -> vector<8x8xf32>
    %cst_21 = arith.constant dense<0xFF800000> : vector<8xf32>
    %47 = vector.multi_reduction <maximumf>, %46, %cst_21 [1] : vector<8x8xf32> to vector<8xf32>
    %48 = vector.shape_cast %47 : vector<8xf32> to vector<8x1xf32>
    %49 = vector.broadcast %48 : vector<8x1xf32> to vector<8x8xf32>
    %50 = arith.subf %46, %49 : vector<8x8xf32>
    %51 = math.exp %50 : vector<8x8xf32>
    %cst_22 = arith.constant dense<0.000000e+00> : vector<8xf32>
    %52 = vector.multi_reduction <add>, %51, %cst_22 [1] : vector<8x8xf32> to vector<8xf32>
    %53 = vector.shape_cast %52 : vector<8xf32> to vector<8x1xf32>
    %54 = tpu.reciprocal %53 : vector<8x1xf32> -> vector<8x1xf32>
    %55 = vector.broadcast %54 : vector<8x1xf32> to vector<8x8xf32>
    %56 = arith.mulf %51, %55 : vector<8x8xf32>
    %57 = arith.truncf %56 : vector<8x8xf32> to vector<8x8xbf16>
    %c0_23 = arith.constant 0 : index
    %c1 = arith.constant 1 : index
    %c0_24 = arith.constant 0 : index
    %c0_25 = arith.constant 0 : index
    %58 = vector.load %arg10[%c0_23, %c1, %c0_24, %c0_25] : memref<1x4x8x8xbf16, #tpu.memory_space<vmem>>, vector<1x1x8x8xbf16>
    %59 = vector.shape_cast %58 : vector<1x1x8x8xbf16> to vector<8x8xbf16>
    %60 = vector.shape_cast %57 : vector<8x8xbf16> to vector<1x1x8x8xbf16>
    tpu.vector_store %arg10[%c0_23, %c1, %c0_24, %c0_25], %60 {strides = array<i32>} : memref<1x4x8x8xbf16, #tpu.memory_space<vmem>>, vector<1x1x8x8xbf16>,
    %61 = arith.truncf %56 : vector<8x8xf32> to vector<8x8xbf16>
    %cst_26 = arith.constant dense<0.000000e+00> : vector<8x8xf32>
    %62 = tpu.matmul %61, %45, %cst_26 {dimension_numbers = #tpu.dot_dimension_numbers<[1], [0], [0], [1], [0, 0, 1, 1], [], []>} : vector<8x8xbf16>, vector<8x8xbf16>, vector<8x8xf32> -> vector<8x8xf32>
    %63 = vector.extract_strided_slice %14 {offsets = [0, 16], sizes = [8, 8], strides = [1, 1]} : vector<8x32xf32> to vector<8x8xf32>
    %64 = arith.truncf %63 : vector<8x8xf32> to vector<8x8xbf16>
    %65 = vector.extract_strided_slice %15 {offsets = [0, 16], sizes = [8, 8], strides = [1, 1]} : vector<8x32xf32> to vector<8x8xf32>
    %66 = arith.truncf %65 : vector<8x8xf32> to vector<8x8xbf16>
    %67 = vector.extract_strided_slice %16 {offsets = [0, 16], sizes = [8, 8], strides = [1, 1]} : vector<8x32xf32> to vector<8x8xf32>
    %68 = arith.truncf %67 : vector<8x8xf32> to vector<8x8xbf16>
    %cst_27 = arith.constant dense<0.000000e+00> : vector<8x8xf32>
    %69 = tpu.matmul %64, %66, %cst_27 {dimension_numbers = #tpu.dot_dimension_numbers<[1], [1], [0], [0], [0, 0, 1, 0], [], []>} : vector<8x8xbf16>, vector<8x8xbf16>, vector<8x8xf32> -> vector<8x8xf32>
    %cst_28 = arith.constant dense<0xFF800000> : vector<8xf32>
    %70 = vector.multi_reduction <maximumf>, %69, %cst_28 [1] : vector<8x8xf32> to vector<8xf32>
    %71 = vector.shape_cast %70 : vector<8xf32> to vector<8x1xf32>
    %72 = vector.broadcast %71 : vector<8x1xf32> to vector<8x8xf32>
    %73 = arith.subf %69, %72 : vector<8x8xf32>
    %74 = math.exp %73 : vector<8x8xf32>
    %cst_29 = arith.constant dense<0.000000e+00> : vector<8xf32>
    %75 = vector.multi_reduction <add>, %74, %cst_29 [1] : vector<8x8xf32> to vector<8xf32>
    %76 = vector.shape_cast %75 : vector<8xf32> to vector<8x1xf32>
    %77 = tpu.reciprocal %76 : vector<8x1xf32> -> vector<8x1xf32>
    %78 = vector.broadcast %77 : vector<8x1xf32> to vector<8x8xf32>
    %79 = arith.mulf %74, %78 : vector<8x8xf32>
    %80 = arith.truncf %79 : vector<8x8xf32> to vector<8x8xbf16>
    %c0_30 = arith.constant 0 : index
    %c2 = arith.constant 2 : index
    %c0_31 = arith.constant 0 : index
    %c0_32 = arith.constant 0 : index
    %81 = vector.load %arg10[%c0_30, %c2, %c0_31, %c0_32] : memref<1x4x8x8xbf16, #tpu.memory_space<vmem>>, vector<1x1x8x8xbf16>
    %82 = vector.shape_cast %81 : vector<1x1x8x8xbf16> to vector<8x8xbf16>
    %83 = vector.shape_cast %80 : vector<8x8xbf16> to vector<1x1x8x8xbf16>
    tpu.vector_store %arg10[%c0_30, %c2, %c0_31, %c0_32], %83 {strides = array<i32>} : memref<1x4x8x8xbf16, #tpu.memory_space<vmem>>, vector<1x1x8x8xbf16>,
    %84 = arith.truncf %79 : vector<8x8xf32> to vector<8x8xbf16>
    %cst_33 = arith.constant dense<0.000000e+00> : vector<8x8xf32>
    %85 = tpu.matmul %84, %68, %cst_33 {dimension_numbers = #tpu.dot_dimension_numbers<[1], [0], [0], [1], [0, 0, 1, 1], [], []>} : vector<8x8xbf16>, vector<8x8xbf16>, vector<8x8xf32> -> vector<8x8xf32>
    %86 = vector.extract_strided_slice %14 {offsets = [0, 24], sizes = [8, 8], strides = [1, 1]} : vector<8x32xf32> to vector<8x8xf32>
    %87 = arith.truncf %86 : vector<8x8xf32> to vector<8x8xbf16>
    %88 = vector.extract_strided_slice %15 {offsets = [0, 24], sizes = [8, 8], strides = [1, 1]} : vector<8x32xf32> to vector<8x8xf32>
    %89 = arith.truncf %88 : vector<8x8xf32> to vector<8x8xbf16>
    %90 = vector.extract_strided_slice %16 {offsets = [0, 24], sizes = [8, 8], strides = [1, 1]} : vector<8x32xf32> to vector<8x8xf32>
    %91 = arith.truncf %90 : vector<8x8xf32> to vector<8x8xbf16>
    %cst_34 = arith.constant dense<0.000000e+00> : vector<8x8xf32>
    %92 = tpu.matmul %87, %89, %cst_34 {dimension_numbers = #tpu.dot_dimension_numbers<[1], [1], [0], [0], [0, 0, 1, 0], [], []>} : vector<8x8xbf16>, vector<8x8xbf16>, vector<8x8xf32> -> vector<8x8xf32>
    %cst_35 = arith.constant dense<0xFF800000> : vector<8xf32>
    %93 = vector.multi_reduction <maximumf>, %92, %cst_35 [1] : vector<8x8xf32> to vector<8xf32>
    %94 = vector.shape_cast %93 : vector<8xf32> to vector<8x1xf32>
    %95 = vector.broadcast %94 : vector<8x1xf32> to vector<8x8xf32>
    %96 = arith.subf %92, %95 : vector<8x8xf32>
    %97 = math.exp %96 : vector<8x8xf32>
    %cst_36 = arith.constant dense<0.000000e+00> : vector<8xf32>
    %98 = vector.multi_reduction <add>, %97, %cst_36 [1] : vector<8x8xf32> to vector<8xf32>
    %99 = vector.shape_cast %98 : vector<8xf32> to vector<8x1xf32>
    %100 = tpu.reciprocal %99 : vector<8x1xf32> -> vector<8x1xf32>
    %101 = vector.broadcast %100 : vector<8x1xf32> to vector<8x8xf32>
    %102 = arith.mulf %97, %101 : vector<8x8xf32>
    %103 = arith.truncf %102 : vector<8x8xf32> to vector<8x8xbf16>
    %c0_37 = arith.constant 0 : index
    %c3 = arith.constant 3 : index
    %c0_38 = arith.constant 0 : index
    %c0_39 = arith.constant 0 : index
    %104 = vector.load %arg10[%c0_37, %c3, %c0_38, %c0_39] : memref<1x4x8x8xbf16, #tpu.memory_space<vmem>>, vector<1x1x8x8xbf16>
    %105 = vector.shape_cast %104 : vector<1x1x8x8xbf16> to vector<8x8xbf16>
    %106 = vector.shape_cast %103 : vector<8x8xbf16> to vector<1x1x8x8xbf16>
    tpu.vector_store %arg10[%c0_37, %c3, %c0_38, %c0_39], %106 {strides = array<i32>} : memref<1x4x8x8xbf16, #tpu.memory_space<vmem>>, vector<1x1x8x8xbf16>,
    %107 = arith.truncf %102 : vector<8x8xf32> to vector<8x8xbf16>
    %cst_40 = arith.constant dense<0.000000e+00> : vector<8x8xf32>
    %108 = tpu.matmul %107, %91, %cst_40 {dimension_numbers = #tpu.dot_dimension_numbers<[1], [0], [0], [1], [0, 0, 1, 1], [], []>} : vector<8x8xbf16>, vector<8x8xbf16>, vector<8x8xf32> -> vector<8x8xf32>
    %109 = tpu.concatenate %39, %62, %85, %108 in 1 : vector<8x8xf32>, vector<8x8xf32>, vector<8x8xf32>, vector<8x8xf32> -> vector<8x32xf32>
    %110 = arith.truncf %109 : vector<8x32xf32> to vector<8x32xbf16>
    %cst_41 = arith.constant dense<0.000000e+00> : vector<8x32xf32>
    %111 = tpu.matmul %110, %11, %cst_41 {dimension_numbers = #tpu.dot_dimension_numbers<[1], [0], [0], [1], [0, 0, 1, 1], [], []>} : vector<8x32xbf16>, vector<32x32xbf16>, vector<8x32xf32> -> vector<8x32xf32>
    %c0_i32 = arith.constant 0 : i32
    %112 = arith.cmpi eq, %arg2, %c0_i32 : i32
    %113 = arith.extui %112 : i1 to i32
    %c0_i32_42 = arith.constant 0 : i32
    %114 = arith.cmpi ne, %113, %c0_i32_42 : i32
    scf.if %114 {
      %c0_47 = arith.constant 0 : index
      %c0_48 = arith.constant 0 : index
      %121 = vector.load %arg8[%c0_47, %c0_48] : memref<1x32xf32, #tpu.memory_space<vmem>>, vector<1x32xf32>
      %122 = vector.broadcast %121 : vector<1x32xf32> to vector<8x32xf32>
      %123 = arith.addf %111, %122 : vector<8x32xf32>
      %c0_49 = arith.constant 0 : index
      %c0_50 = arith.constant 0 : index
      %124 = vector.load %arg11[%c0_49, %c0_50] : memref<8x32xf32, #tpu.memory_space<vmem>>, vector<8x32xf32>
      tpu.vector_store %arg11[%c0_49, %c0_50], %123 {strides = array<i32>} : memref<8x32xf32, #tpu.memory_space<vmem>>, vector<8x32xf32>,
    } else {
    }
    %c0_i32_43 = arith.constant 0 : i32
    %115 = arith.cmpi ne, %arg2, %c0_i32_43 : i32
    %116 = arith.extui %115 : i1 to i32
    %c0_i32_44 = arith.constant 0 : i32
    %117 = arith.cmpi ne, %116, %c0_i32_44 : i32
    scf.if %117 {
      %c0_47 = arith.constant 0 : index
      %c0_48 = arith.constant 0 : index
      %121 = vector.load %arg11[%c0_47, %c0_48] : memref<8x32xf32, #tpu.memory_space<vmem>>, vector<8x32xf32>
      %122 = arith.addf %121, %111 : vector<8x32xf32>
      %c0_49 = arith.constant 0 : index
      %c0_50 = arith.constant 0 : index
      %123 = vector.load %arg11[%c0_49, %c0_50] : memref<8x32xf32, #tpu.memory_space<vmem>>, vector<8x32xf32>
      tpu.vector_store %arg11[%c0_49, %c0_50], %122 {strides = array<i32>} : memref<8x32xf32, #tpu.memory_space<vmem>>, vector<8x32xf32>,
    } else {
    }
    %c0_i32_45 = arith.constant 0 : i32
    %118 = arith.cmpi eq, %arg2, %c0_i32_45 : i32
    %119 = arith.extui %118 : i1 to i32
    %c0_i32_46 = arith.constant 0 : i32
    %120 = arith.cmpi ne, %119, %c0_i32_46 : i32
    scf.if %120 {
      %c0_47 = arith.constant 0 : index
      %c0_48 = arith.constant 0 : index
      %121 = vector.load %arg11[%c0_47, %c0_48] : memref<8x32xf32, #tpu.memory_space<vmem>>, vector<8x32xf32>
      %c0_49 = arith.constant 0 : index
      %c0_50 = arith.constant 0 : index
      %c0_51 = arith.constant 0 : index
      %122 = vector.load %arg9[%c0_49, %c0_50, %c0_51] : memref<1x8x32xf32, #tpu.memory_space<vmem>>, vector<1x8x32xf32>
      %123 = vector.shape_cast %122 : vector<1x8x32xf32> to vector<8x32xf32>
      %124 = vector.shape_cast %121 : vector<8x32xf32> to vector<1x8x32xf32>
      tpu.vector_store %arg9[%c0_49, %c0_50, %c0_51], %124 {strides = array<i32>} : memref<1x8x32xf32, #tpu.memory_space<vmem>>, vector<1x8x32xf32>,
    } else {
    }
    return
  }
  func.func @transform_0(%arg0: i32, %arg1: i32, %arg2: i32) -> (i32, i32, i32) {
    %c0_i32 = arith.constant 0 : i32
    %c0_i32_0 = arith.constant 0 : i32
    %c0_i32_1 = arith.constant 0 : i32
    return %arg0, %c0_i32, %c0_i32_0 : i32, i32, i32
  }
  func.func @transform_1(%arg0: i32, %arg1: i32, %arg2: i32) -> (i32, i32, i32) {
    %c0_i32 = arith.constant 0 : i32
    %c0_i32_0 = arith.constant 0 : i32
    %c0_i32_1 = arith.constant 0 : i32
    %c0_i32_2 = arith.constant 0 : i32
    return %c0_i32, %c0_i32_0, %c0_i32_1 : i32, i32, i32
  }
  func.func @transform_2(%arg0: i32, %arg1: i32, %arg2: i32) -> (i32, i32, i32) {
    %c0_i32 = arith.constant 0 : i32
    %c0_i32_0 = arith.constant 0 : i32
    %c0_i32_1 = arith.constant 0 : i32
    %c0_i32_2 = arith.constant 0 : i32
    return %c0_i32, %c0_i32_0, %c0_i32_1 : i32, i32, i32
  }
  func.func @transform_3(%arg0: i32, %arg1: i32, %arg2: i32) -> (i32, i32, i32) {
    %c0_i32 = arith.constant 0 : i32
    %c0_i32_0 = arith.constant 0 : i32
    %c0_i32_1 = arith.constant 0 : i32
    %c0_i32_2 = arith.constant 0 : i32
    return %c0_i32, %c0_i32_0, %c0_i32_1 : i32, i32, i32
  }
  func.func @transform_4(%arg0: i32, %arg1: i32, %arg2: i32) -> (i32, i32, i32) {
    %c0_i32 = arith.constant 0 : i32
    %c0_i32_0 = arith.constant 0 : i32
    %c0_i32_1 = arith.constant 0 : i32
    %c0_i32_2 = arith.constant 0 : i32
    return %c0_i32, %c0_i32_0, %c0_i32_1 : i32, i32, i32
  }
  func.func @transform_5(%arg0: i32, %arg1: i32, %arg2: i32) -> (i32, i32) {
    %c0_i32 = arith.constant 0 : i32
    %c0_i32_0 = arith.constant 0 : i32
    %c0_i32_1 = arith.constant 0 : i32
    return %c0_i32, %c0_i32_0 : i32, i32
  }
  func.func @transform_6(%arg0: i32, %arg1: i32, %arg2: i32) -> (i32, i32, i32) {
    %c0_i32 = arith.constant 0 : i32
    %c0_i32_0 = arith.constant 0 : i32
    return %arg0, %arg1, %c0_i32 : i32, i32, i32
  }
  func.func @transform_7(%arg0: i32, %arg1: i32, %arg2: i32) -> (i32, i32, i32, i32) {
    %c0_i32 = arith.constant 0 : i32
    %c0_i32_0 = arith.constant 0 : i32
    return %arg0, %arg2, %arg1, %c0_i32 : i32, i32, i32, i32
  }
}

</mosaic_0001>

<bundles_post_ra>
// kernel: tpu_custom_call.1
= control target key start
LH: loop header
LB: loop body
LE: loop exit
PB: predicated region body
PF: predicated region fallthrough
CT: control target
= control target key end

     0   :  { %s2389_s0 = inlined_call_operand.hbm [shape: bf16[2,8,32], index: 0, kind: input, shape index: {}]   ;;  %s2390_s1 = inlined_call_operand.hbm [shape: bf16[1,32,32], index: 1, kind: input, shape index: {}]   ;;  %s2391_s2 = inlined_call_operand.hbm [shape: bf16[1,32,32], index: 2, kind: input, shape index: {}]   ;;  %s2392_s3 = inlined_call_operand.hbm [shape: bf16[1,32,32], index: 3, kind: input, shape index: {}]   ;;  %s2393_s4 = inlined_call_operand.hbm [shape: bf16[1,32,32], index: 4, kind: input, shape index: {}]   ;;  %s2394_s5 = inlined_call_operand.vmem [shape: f32[1,32], index: 5, kind: input, shape index: {}]   ;;  %s2395_s6 = inlined_call_operand.hbm [shape: f32[2,8,32], index: 6, kind: output, shape index: {0}]   ;;  %s2396_s7 = inlined_call_operand.hbm [shape: bf16[2,4,8,8], index: 7, kind: output, shape index: {1}]  }
   0x1   :  { %2403 = sst [smem:[#allocation20_spill]] %s2390_s1 }
   0x2   :  { %2404 = sst [smem:[#allocation21_spill]] %s2395_s6 }
   0x3   :  { %13 = vsyncpa [#allocation4], 0 }
   0x4   :  { %15 = vsyncpa [#allocation4 + $0x1], 0 }
   0x5   :  { %16 = vsyncpa [#allocation7], 0 }
   0x6   :  { %17 = vsyncpa [#allocation10], 0 }
   0x7   :  { %18 = vsyncpa [#allocation5], 0 }
   0x8   :  { %20 = vsyncpa [#allocation5 + $0x1], 0 }
   0x9   :  { %21 = vsyncpa [#allocation14], 0 }
   0xa   :  { %23 = vsyncpa [#allocation14 + $0x1], 0  ;;  %s1954_s24 = smov 0   ;;  %s1956_s25 = smov 0  }
   0xb   :  { %s1958_s26 = smov 0   ;;  %s1960_s27 = smov 0  }
   0xc   :  { %s1962_s28 = smov 0   ;;  %s1964_s29 = smov 0  }
   0xd LB: > { %s2397_s30 = sadd.s32 4294967295, %s1893_s29   ;;  %p1329_p0 = scmp.ge.s32.totalorder %s1893_s29, 1  ;;  %s1893_s29 = sphi %s1964_s29, %s29_s29   ;;  %s1889_s28 = sphi %s1962_s28, %s2427_s28   ;;  %s1885_s27 = sphi %s1960_s27, %s2426_s27   ;;  %s1881_s26 = sphi %s1958_s26, %s2425_s26   ;;  %s1877_s25 = sphi %s1956_s25, %s2424_s25   ;;  %s1873_s24 = sphi %s1954_s24, %s2423_s24  }
   0xe   : > { %p1988_p1 = scmp.eq.s32.totalorder %s2397_s30, 0  ;;  %p242_p2 = scmp.lt.s32.totalorder %s1893_s29, 3 }
   0xf   : > { %s1895_s10 = smov [#allocation6]   ;;  %s1896_s13 = smov [#allocation9]  }
  0x10   : > { %s2405_s8 = scalar_select %p1988_p1, 1, 0 }
  0x11   : > { %p1993_p3 = pnand %p1329_p0, %p242_p2  ;;  %s254_s11 = sshll.u32 %s1895_s10, 4  ;;  %s1997_s11 = int_to_ptr.vmem [resolvable:$true] %s254_s11 }
  0x12   : > { %s280_s14 = sshll.u32 %s1896_s13, 4  ;;  %s1897_s15 = smov [#allocation8]   ;;  %s2008_s14 = int_to_ptr.vmem [resolvable:$true] %s280_s14 }
  0x13   : > { %s2406_s9 = scalar_select %p1993_p3, 1, 0 }
  0x14   : > { %p1507_p4 = pneg %p1993_p3  ;;  %s2010_s16 = sshll.u32 %s1897_s15, 4  ;;  %s268_s16 = int_to_ptr.vmem [resolvable:$true] %s2010_s16 }
  0x15   : > { %s2408_s1 = sld [smem:[#allocation20_spill]] }
  0x16   : > { %p2004_p6 = pnand %p1507_p4, %p1988_p1 }
  0x18   : > { %p2020_p8 = pneg %p2004_p6 }
  0x1b   : > { %s1629_s19 = scalar_lea.hbm %s2408_s1, 256 }
  0x1c   : > { %p1630_p7 = scmp.ne.s32.totalorder %s2408_s1, %s1629_s19  ;;  %p1636_p11 = scmp.lt.u32.totalorder %s1629_s19, %s2408_s1 }
  0x1e   : > { %p1632_p9 = pnand %p2020_p8, %p1630_p7 }
  0x20   : > { %p1633_p10 = pneg %p1632_p9 }
  0x22   : > { %p1638_p12 = pnand %p1636_p11, %p1633_p10 }
  0x24   : > { %1641 = shalt.err (!%p1638_p12)
}
  0x25   : > { %s1642_s13 = scalar_lea.vmem %s1997_s11, 256  ;;  %p1650_p4 = scmp.lt.s32.totalorder %s1997_s11, %s1997_s11 }
  0x26   : > { %p1643_p13 = scmp.ne.s32.totalorder %s1997_s11, %s1642_s13  ;;  %p1651_p5 = scmp.lt.s32.totalorder %s1642_s13, %s1642_s13 }
  0x28   : > { %p1645_p0 = pnand %p1643_p13, %p2020_p8  ;;  %p1652_p7 = por %p1651_p5, %p1650_p4 }
  0x2a   : > { %p1646_p2 = pneg %p1645_p0 }
  0x2c   : > { %p1653_p9 = pnand %p1652_p7, %p1646_p2 }
  0x2e   : > { %1656 = shalt.err (!%p1653_p9)
}
  0x2f   : > { %s1898_s15 = smov 64   ;;  %s1899_s17 = smov 4  }
  0x30   : > { %1510 = dma.hbm_to_vmem [thread:$0]  (!%p2004_p6), %s2408_s1, 256, %s1997_s11, [#allocation7], %s1898_s15, %s1898_s15, %s1899_s17  }
  0x31   : > { %s1657_s23 = scalar_lea.hbm %s2392_s3, 256 }
  0x32   : > { %p1658_p5 = scmp.ne.s32.totalorder %s2392_s3, %s1657_s23  ;;  %p1664_p12 = scmp.lt.u32.totalorder %s1657_s23, %s2392_s3 }
  0x34   : > { %p1660_p10 = pnand %p1658_p5, %p2020_p8 }
  0x36   : > { %p1661_p11 = pneg %p1660_p10 }
  0x38   : > { %p1666_p13 = pnand %p1664_p12, %p1661_p11 }
  0x3a   : > { %1669 = shalt.err (!%p1666_p13)
}
  0x3b   : > { %s1670_s11 = scalar_lea.vmem %s2008_s14, 256  ;;  %p1678_p7 = scmp.lt.s32.totalorder %s2008_s14, %s2008_s14 }
  0x3c   : > { %p1671_p0 = scmp.ne.s32.totalorder %s2008_s14, %s1670_s11  ;;  %p1679_p9 = scmp.lt.s32.totalorder %s1670_s11, %s1670_s11 }
  0x3e   : > { %p1673_p2 = pnand %p1671_p0, %p2020_p8  ;;  %p1680_p5 = por %p1679_p9, %p1678_p7 }
  0x40   : > { %p1674_p4 = pneg %p1673_p2 }
  0x42   : > { %p1681_p10 = pnand %p1680_p5, %p1674_p4 }
  0x44   : > { %1684 = shalt.err (!%p1681_p10)
}
  0x45   : > { %1516 = dma.hbm_to_vmem [thread:$0]  (!%p2004_p6), %s2392_s3, 256, %s2008_s14, [#allocation10], %s1898_s15, %s1898_s15, %s1899_s17  }
  0x46   : > { %s1685_s20 = scalar_lea.hbm %s2391_s2, 256 }
  0x47   : > { %p1686_p11 = scmp.ne.s32.totalorder %s2391_s2, %s1685_s20  ;;  %p1692_p0 = scmp.lt.u32.totalorder %s1685_s20, %s2391_s2 }
  0x49   : > { %p1688_p12 = pnand %p1686_p11, %p2020_p8 }
  0x4b   : > { %p1689_p13 = pneg %p1688_p12 }
  0x4d   : > { %p1694_p2 = pnand %p1692_p0, %p1689_p13 }
  0x4f   : > { %1697 = shalt.err (!%p1694_p2)
}
  0x50   : > { %s1698_s11 = scalar_lea.vmem %s268_s16, 256  ;;  %p1706_p5 = scmp.lt.s32.totalorder %s268_s16, %s268_s16 }
  0x51   : > { %p1699_p4 = scmp.ne.s32.totalorder %s268_s16, %s1698_s11  ;;  %p1707_p10 = scmp.lt.s32.totalorder %s1698_s11, %s1698_s11 }
  0x53   : > { %p1701_p7 = pnand %p1699_p4, %p2020_p8  ;;  %p1708_p3 = por %p1707_p10, %p1706_p5 }
  0x55   : > { %p1702_p9 = pneg %p1701_p7 }
  0x57   : > { %p1709_p1 = pnand %p1708_p3, %p1702_p9 }
  0x59   : > { %1712 = shalt.err (!%p1709_p1)
}
  0x5a   : > { %1513 = dma.hbm_to_vmem [thread:$0]  (!%p2004_p6), %s2391_s2, 256, %s268_s16, [#allocation7], %s1898_s15, %s1898_s15, %s1899_s17  }
  0x5b   : > { %s1900_s30 = smov [#allocation11]   ;;  %s1713_s21 = scalar_lea.hbm %s2393_s4, 256 }
  0x5c   : > { %s293_s18 = sshll.u32 %s1900_s30, 4  ;;  %p1714_p1 = scmp.ne.s32.totalorder %s2393_s4, %s1713_s21  ;;  %s294_s18 = int_to_ptr.vmem [resolvable:$true] %s293_s18 }
  0x5d   : > { %p1720_p12 = scmp.lt.u32.totalorder %s1713_s21, %s2393_s4 }
  0x5e   : > { %p1716_p3 = pnand %p1714_p1, %p2020_p8 }
  0x60   : > { %p1717_p11 = pneg %p1716_p3 }
  0x62   : > { %p1722_p13 = pnand %p1720_p12, %p1717_p11 }
  0x64   : > { %1725 = shalt.err (!%p1722_p13)
}
  0x65   : > { %s1726_s16 = scalar_lea.vmem %s294_s18, 256  ;;  %p1734_p7 = scmp.lt.s32.totalorder %s294_s18, %s294_s18 }
  0x66   : > { %p1727_p0 = scmp.ne.s32.totalorder %s294_s18, %s1726_s16  ;;  %p1735_p9 = scmp.lt.s32.totalorder %s1726_s16, %s1726_s16 }
  0x68   : > { %p1729_p2 = pnand %p1727_p0, %p2020_p8  ;;  %p1736_p5 = por %p1735_p9, %p1734_p7 }
  0x6a   : > { %p1730_p4 = pneg %p1729_p2 }
  0x6c   : > { %p1737_p10 = pnand %p1736_p5, %p1730_p4 }
  0x6e   : > { %1740 = shalt.err (!%p1737_p10)
}
  0x6f   : > { %1519 = dma.hbm_to_vmem [thread:$0]  (!%p2004_p6), %s2393_s4, 256, %s294_s18, [#allocation10], %s1898_s15, %s1898_s15, %s1899_s17  }
  0x70   : > { %s1328_s12 = sadd.s32 4294967294, %s1893_s29   ;;  %s48_s22 = sadd.s32 1, %s1889_s28 }
  0x71   : > { %p50_p8 = scmp.ge.s32.totalorder %s48_s22, 2  ;;  %s55_s30 = sadd.s32 1, %s1881_s26 }
  0x72   : > { %p62_p1 = scmp.ne.s32.totalorder %s1881_s26, %s1877_s25  ;;  %p63_p3 = scmp.eq.s32.totalorder %s1893_s29, 0 }
  0x73   : > { %s2429_s22 = smov (%p50_p8, %s48_s22), 0  ;;  %p68_p12 = scmp.ne.s32.totalorder %s1877_s25, %s1873_s24 }
  0x74   : > { %p2121_p11 = por %p63_p3, %p62_p1  ;;  %s52_s15 = ssub.s32 %s1889_s28, %s2429_s22 }
  0x75   : > { %s2411_s17 = sadd.s32 4294967295, %s1893_s29   ;;  %p53_p13 = scmp.eq.s32.totalorder %s52_s15, 0 }
  0x76   : > { %p199_p6 = scmp.eq.s32.totalorder %s2411_s17, 1  ;;  %p2412_p0 = scmp.ne.s32.totalorder %s2405_s8, 0 }
  0x77   : > { %p205_p7 = scmp.eq.s32.totalorder %s1328_s12, 1  ;;  %p1535_p5 = scmp.lt.s32.totalorder %s1893_s29, 2 }
  0x78   : > { %p2133_p2 = por %p2412_p0, %p68_p12  ;;  %p2137_p4 = por %p199_p6, %p62_p1 }
  0x79   : > { %s2142_s21 = scalar_select %p53_p13, %s1881_s26, %s55_s30  }
  0x7a   : > { %s2414_s20 = scalar_select %p2137_p4, 1, 0 }
  0x7b   : > { %p2144_p9 = por %p205_p7, %p68_p12  ;;  %s310_s10 = sand.u32 1, %s1881_s26  }
  0x7c   : > { %s1336_s13 = sshll.u32 %s1889_s28, 6  ;;  %s1335_s11 = sshll.u32 %s310_s10, 2 }
  0x7d   : > { %s2415_s23 = scalar_select %p2144_p9, 1, 0 }
  0x7e   : > { %s2154_s6 = scalar_lea.hbm %s2389_s0, %s1336_s13  ;;  %s314_s12 = scalar_lea.vmem [#allocation3], %s1335_s11 }
  0x7f   : > { %s321_s30 = sshll.u32 %s314_s12, 4  ;;  %p2158_p10 = pnand %p1535_p5, %p2121_p11  ;;  %s2162_s30 = int_to_ptr.vmem [resolvable:$true] %s321_s30 }
  0x80   : > { %s311_s17 = scalar_lea.sflag [#allocation4], %s310_s10  ;;  %s1741_s1 = scalar_lea.hbm %s2154_s6, 64 }
  0x81   : > { %p1742_p8 = scmp.ne.s32.totalorder %s2154_s6, %s1741_s1  ;;  %p1743_p1 = pneg %p2158_p10 }
  0x82   : > { %s1746_s19 = scalar_lea.hbm %s2389_s0, 128  ;;  %p1747_p11 = scmp.lt.u32.totalorder %s2154_s6, %s2389_s0 }
  0x83   : > { %p1744_p3 = pnand %p1743_p1, %p1742_p8  ;;  %p1748_p6 = scmp.lt.u32.totalorder %s1746_s19, %s1741_s1 }
  0x84   : > { %p1750_p0 = scmp.lt.u32.totalorder %s1741_s1, %s2154_s6 }
  0x85   : > { %p1745_p12 = pneg %p1744_p3  ;;  %p1749_p13 = por %p1748_p6, %p1747_p11 }
  0x87   : > { %p1751_p7 = por %p1750_p0, %p1749_p13 }
  0x89   : > { %p1752_p5 = pnand %p1751_p7, %p1745_p12 }
  0x8b   : > { %1755 = shalt.err (!%p1752_p5)
}
  0x8c   : > { %s1756_s10 = scalar_lea.vmem %s2162_s30, 64  ;;  %s1901_s12 = smov [#allocation3]  }
  0x8d   : > { %p1757_p8 = scmp.ne.s32.totalorder %s2162_s30, %s1756_s10  ;;  %s1761_s13 = sshll.u32 %s1901_s12, 4  ;;  %s1762_s13 = int_to_ptr.vmem [resolvable:$false] %s1761_s13 }
  0x8e   : > { %s1763_s11 = scalar_lea.vmem %s1762_s13, 128  ;;  %p1764_p4 = scmp.lt.s32.totalorder %s2162_s30, %s1762_s13 }
  0x8f   : > { %p1759_p3 = pnand %p1757_p8, %p1743_p1  ;;  %p1765_p11 = scmp.lt.s32.totalorder %s1763_s11, %s1756_s10 }
  0x91   : > { %p1760_p9 = pneg %p1759_p3  ;;  %p1766_p6 = por %p1765_p11, %p1764_p4 }
  0x93   : > { %p1767_p13 = pnand %p1766_p6, %p1760_p9 }
  0x95   : > { %1770 = shalt.err (!%p1767_p13)
}
  0x96   : > { %1523 = dma.hbm_to_vmem [thread:$0]  (!%p2158_p10), %s2154_s6, 64, %s2162_s30, %s311_s17  }
  0x97   : > { %p2417_p12 = scmp.ne.s32.totalorder %s2406_s9, 0 }
  0x98   : > { %s2192_s1 = sand.u32 (!%p2417_p12), 1, %s1877_s25  }
  0x99   : > { %330 = sbr.rel (%p2417_p12) target bundleno = 1624 (0x658), region = 44  ;;  %s1338_s19 = sshll.u32 (!%p2417_p12), %s2192_s1, 2 }
  0x9a   : > { %s333_s16 = scalar_lea.sflag (!%p2417_p12), [#allocation4], %s2192_s1  ;;  %s336_s14 = scalar_lea.vmem (!%p2417_p12), [#allocation3], %s1338_s19 }
  0xa0   : > { %1852 = dma.done.wait (%p2133_p2), %s333_s16, 64  }
  0xa1   : > { %1854 = vsyncadd (%p2133_p2), %s333_s16, 4294967232  ;;  %p2418_p4 = scmp.ne.s32.totalorder %s2405_s8, 0 }
  0xa3   : > { %1856 = dma.done.wait (%p2418_p4), [#allocation7], 512  }
  0xa4   : > { %1858 = vsyncadd (%p2418_p4), [#allocation7], 4294966784 }
  0xa5   : > { %1860 = dma.done.wait (%p2418_p4), [#allocation10], 512  }
  0xa6   : > { %1862 = vsyncadd (%p2418_p4), [#allocation10], 4294966784  ;;  %v1902_v0 = vmov 0.0   ;;  %vm1903_vm0 = vmmov 0   ;;  %v1605_v1 = vld [vmem:[#allocation8] sm:$0xff]   ;;  %v1606_v2 = vld [vmem:[#allocation6] sm:$0xff]  }
  0xa7   : > { %1413 = vmatprep.subr.bf16.mxu1 %v1902_v0  ;;  %1405 = vmatprep.subr.bf16.mxu0 %v1902_v0  ;;  %v1607_v3 = vld [vmem:[#allocation8 + $0x8] sm:$0xff]   ;;  %vm428_vm1 = vcmask 261120   ;;  %v1608_v5 = vld [vmem:[#allocation6 + $0x8] sm:$0xff]   ;;  %vm579_vm2 = vcmask 64512   ;;  %s1904_s8 = smov 112   ;;  %s1905_s9 = smov 120  }
  0xa8   : > { %1417 = vmatprep.mubr.msk.bf16.mxu1 %vm1903_vm0, %v1902_v0  ;;  %1409 = vmatprep.mubr.msk.bf16.mxu0 %vm1903_vm0, %v1902_v0  ;;  %v415_v4 = vld [vmem:[%s336_s14] sm:$0xf]  ;;  %s1906_s18 = smov 104   ;;  %v1609_v17 = vld [vmem:[#allocation9] sm:$0xff]   ;;  %v1610_v18 = vld [vmem:[#allocation9 + $0x8] sm:$0xff]   ;;  %vm643_vm3 = vcmask 1043456  }
  0xa9   : > { %1414 = vmatpush3.bf16.msra.mxu1 %v1605_v1  ;;  %1406 = vmatpush3.bf16.msra.mxu0 %v1606_v2  ;;  %s1344_s6 = sshll.u32 %s2192_s1, 4  ;;  %vm638_vm4 = vcmask 60416   ;;  %s1907_s15 = smov 8   ;;  %vm1039_vm5 = vcmask 130048   ;;  %vm1041_vm6 = vcmask 195584  }
  0xaa   : > { %1415 = vmatprep.subr.bf16.mxu1 %v1902_v0  ;;  %1407 = vmatprep.subr.bf16.mxu0 %v1902_v0  ;;  %s2270_s30 = scalar_lea.vmem [#allocation13], %s1344_s6  ;;  %s1908_s17 = smov 16  }
  0xab   : > { %s1909_s10 = smov 24   ;;  %s1376_s12 = sshll.u32 %s1885_s27, 8 }
  0xac   : > { %s1160_s13 = sshll.u32 %s2270_s30, 4  ;;  %s2302_s16 = scalar_lea.hbm %s2396_s7, %s1376_s12  ;;  %s2304_s13 = int_to_ptr.vmem [resolvable:$true] %s1160_s13 }
  0xad   : > { %1416 = vmatpush3.bf16.msra.mxu1 %v1607_v3  ;;  %1408 = vmatpush3.bf16.msra.mxu0 %v1608_v5  ;;  %s1130_s14 = scalar_lea.sflag [#allocation14], %s2192_s1  ;;  %p2419_p9 = scmp.ne.s32.totalorder %s2414_s20, 0 }
  0xae   : > { %1429 = vmatprep.subr.bf16.mxu1 %v1902_v0  ;;  %1421 = vmatprep.subr.bf16.mxu0 %v1902_v0 }
  0xb0   : > { %1418 = vmatmul.mubr.msk.bf16.vlgmr.msra.gmra.mrb[0].mxu1 %vm428_vm1, %v415_v4  ;;  %1410 = vmatmul.mubr.msk.bf16.vlgmr.msra.gmra.mrb[0].mxu0 %vm428_vm1, %v415_v4 }
  0xb1   : > { %1431 = vmatprep.mubr.msk.bf16.mxu1 %vm1903_vm0, %v1902_v0  ;;  %1425 = vmatprep.mubr.msk.bf16.mxu0 %vm1903_vm0, %v1902_v0 }
  0xb2   : > { %1422 = vmatpush3.bf16.msra.mxu0 %v1609_v17 }
  0xb3   : > { %1423 = vmatprep.subr.bf16.mxu0 %v1902_v0 }
  0xb6   : > { %1424 = vmatpush3.bf16.msra.mxu0 %v1610_v18 }
  0xb7   : > { %1435 = vmatprep.subr.bf16.mxu0 %v1902_v0 }
  0xb9   : > { %1426 = vmatmul.mubr.msk.bf16.vlgmr.msra.gmra.mrb[4].mxu0 %vm428_vm1, %v415_v4 }
  0xba   : > { %1437 = vmatprep.mubr.msk.bf16.mxu0 %vm1903_vm0, %v1902_v0 }
 0x183   : > { %v518_v6 = vpop.f32.mrb[0].mxu1  ;;  %v466_v9 = vpop.f32.mrb[0].mxu0 }
 0x184   : > { %v577_v7 = vpack.c.bf16 %v518_v6, %v518_v6  ;;  %v1419_v8 = vpop.f32.mrb[1].mxu1  ;;  %v1411_v11 = vpop.f32.mrb[1].mxu0  ;;  %v576_v13 = vpack.c.bf16 %v466_v9, %v466_v9 }
 0x185   : > { %v521_v10 = vpop.f32.mrb[2].mxu1  ;;  %v469_v15 = vpop.f32.mrb[2].mxu0 }
 0x186   : > { %804 = vrot.lane.b32.xlu1 %v577_v7, %s1904_s8  ;;  %691 = vrot.lane.b32.xlu0 %v577_v7, %s1905_s9  ;;  %v1420_v12 = vpop.f32.mrb[3].mxu1  ;;  %v584_v14 = vsel %vm579_vm2, %v577_v7, 0  ;;  %v1412_v16 = vpop.f32.mrb[3].mxu0 }
 0x187   : > { %1430 = vmatpush3.bf16.xpose.msra.mxu1 %v584_v14 }
 0x188   : > { %1441 = vmatprep.subr.bf16.mxu1 %v1902_v0 }
 0x18a   : > { %802 = vrot.lane.b32.xlu1 %v576_v13, %s1904_s8  ;;  %688 = vrot.lane.b32.xlu0 %v576_v13, %s1905_s9 }
 0x18c   : > { %v570_v33 = vpop.f32.mrb[4].mxu0 }
 0x18d   : > { %v578_v34 = vpack.c.bf16 %v570_v33, %v570_v33  ;;  %v1427_v35 = vpop.f32.mrb[5].mxu0 }
 0x18e   : > { %914 = vrot.lane.b32.xlu1 %v576_v13, %s1906_s18  ;;  %916 = vrot.lane.b32.xlu0 %v577_v7, %s1906_s18  ;;  %v573_v36 = vpop.f32.mrb[6].mxu0 }
 0x18f   : > { %1432 = vmatmul.mubr.msk.bf16.vlgmr.msra.gmra.mrb[4].mxu1 %vm579_vm2, %v576_v13  ;;  %v1428_v37 = vpop.f32.mrb[7].mxu0  ;;  %v645_v38 = vsel %vm643_vm3, %v578_v34, 0 }
 0x190   : > { %1443 = vmatprep.mubr.msk.bf16.mxu1 %vm1903_vm0, %v1902_v0  ;;  %1436 = vmatpush3.bf16.msra.mxu0 %v645_v38  ;;  %v1611_v37 = vld [vmem:[#allocation11] sm:$0xff]  }
 0x191   : > { %1447 = vmatprep.subr.bf16.mxu0 %v1902_v0 }
 0x1f8   : > { %v692_v19 = vpop.permute.xlu0 %691  ;;  %v805_v21 = vpop.permute.xlu1 %804 }
 0x1f9   : > { %v697_v20 = vsel %vm579_vm2, %v692_v19, 0  ;;  %v810_v23 = vsel %vm579_vm2, %v805_v21, 0 }
 0x1fa   : > { %1442 = vmatpush3.bf16.xpose.msra.mxu1 %v697_v20 }
 0x1fb   : > { %1453 = vmatprep.subr.bf16.mxu1 %v1902_v0 }
 0x1fc   : > { %v689_v22 = vpop.permute.xlu0 %688  ;;  %v803_v25 = vpop.permute.xlu1 %802 }
 0x200   : > { %v917_v24 = vpop.permute.xlu0 %916  ;;  %v915_v27 = vpop.permute.xlu1 %914 }
 0x201   : > { %1444 = vmatmul.mubr.msk.bf16.vlgmr.msra.gmra.mrb[8].mxu1 %vm579_vm2, %v689_v22  ;;  %v922_v26 = vsel %vm579_vm2, %v917_v24, 0 }
 0x202   : > { %1454 = vmatpush3.bf16.xpose.msra.mxu1 %v810_v23  ;;  %1455 = vmatprep.mubr.msk.bf16.mxu1 %vm1903_vm0, %v1902_v0 }
 0x203   : > { %1465 = vmatprep.subr.bf16.mxu1 %v1902_v0 }
 0x209   : > { %1456 = vmatmul.mubr.msk.bf16.vlgmr.msra.gmra.mrb[12].mxu1 %vm579_vm2, %v803_v25 }
 0x20a   : > { %1466 = vmatpush3.bf16.xpose.msra.mxu1 %v922_v26  ;;  %1467 = vmatprep.mubr.msk.bf16.mxu1 %vm1903_vm0, %v1902_v0 }
 0x20b   : > { %1477 = vmatprep.subr.bf16.mxu1 %v1902_v0 }
 0x211   : > { %1468 = vmatmul.mubr.msk.bf16.vlgmr.msra.gmra.mrb[16].mxu1 %vm579_vm2, %v915_v27 }
 0x212   : > { %1481 = vmatprep.mubr.msk.bf16.mxu1 %vm1903_vm0, %v1902_v0  ;;  %1478 = vmatpush3.bf16.msra.mxu1 %v1611_v37 }
 0x213   : > { %1479 = vmatprep.subr.bf16.mxu1 %v1902_v0 }
 0x262   : > { %v620_v28 = vpop.f32.mrb[4].mxu1 }
 0x263   : > { %v1433_v29 = vpop.f32.mrb[5].mxu1  ;;  %v626_v30 = vsel %vm579_vm2, %v620_v28, -inf }
 0x264   : > { %627 = vmax.xlane.f32.xlu0 %v626_v30  ;;  %v623_v31 = vpop.f32.mrb[6].mxu1 }
 0x265   : > { %v1434_v32 = vpop.f32.mrb[7].mxu1 }
 0x2d4   : > { %v733_v39 = vpop.f32.mrb[8].mxu1 }
 0x2d5   : > { %v1445_v40 = vpop.f32.mrb[9].mxu1  ;;  %v739_v41 = vsel %vm579_vm2, %v733_v39, -inf }
 0x2d6   : > { %740 = vmax.xlane.f32.xlu1 %v739_v41  ;;  %v736_v42 = vpop.f32.mrb[10].mxu1 }
 0x2d7   : > { %v1446_v43 = vpop.f32.mrb[11].mxu1  ;;  %v1612_v42 = vld [vmem:[#allocation11 + $0x8] sm:$0xff]  }
 0x2d8   : > { %1480 = vmatpush3.bf16.msra.mxu1 %v1612_v42 }
 0x2dc   : > { %v846_v44 = vpop.f32.mrb[12].mxu1 }
 0x2dd   : > { %v1457_v45 = vpop.f32.mrb[13].mxu1  ;;  %v852_v46 = vsel %vm579_vm2, %v846_v44, -inf }
 0x2de   : > { %853 = vmax.xlane.f32.xlu0 %v852_v46  ;;  %v849_v47 = vpop.f32.mrb[14].mxu1 }
 0x2df   : > { %v1458_v48 = vpop.f32.mrb[15].mxu1 }
 0x2e4   : > { %v958_v49 = vpop.f32.mrb[16].mxu1 }
 0x2e5   : > { %v1469_v50 = vpop.f32.mrb[17].mxu1  ;;  %v964_v51 = vsel %vm579_vm2, %v958_v49, -inf }
 0x2e6   : > { %965 = vmax.xlane.f32.xlu0 %v964_v51  ;;  %v961_v52 = vpop.f32.mrb[18].mxu1 }
 0x2e7   : > { %v1470_v53 = vpop.f32.mrb[19].mxu1 }
 0x2f1   : > { %v628_v54 = vpop.xlane.xlu0 %627 }
 0x2f2   : > { %v629_v55 = vsub.f32 %v620_v28, %v628_v54 }
 0x2f4   : > { %v630_v56 = vmul.f32 1.442695, %v629_v55 }
 0x2f6   : > { %1613 = vpow2.f32 %v630_v56 }
 0x300   : > { %v1614_v57 = vpop.eup %1613 }
 0x301   : > { %v632_v58 = vsel %vm579_vm2, %v1614_v57, 0.0 }
 0x302   : > { %633 = vadd.xlane.f32.xlu1 %v632_v58 }
 0x313   : > { %754 = vrot.lane.b32.xlu1 %v578_v34, %s1905_s9  ;;  %s1910_s9 = smov [#allocation13]  }
 0x363   : > { %v741_v59 = vpop.xlane.xlu1 %740 }
 0x364   : > { %v742_v60 = vsub.f32 %v733_v39, %v741_v59 }
 0x366   : > { %v743_v61 = vmul.f32 1.442695, %v742_v60 }
 0x368   : > { %1615 = vpow2.f32 %v743_v61 }
 0x36b   : > { %v854_v62 = vpop.xlane.xlu0 %853 }
 0x36c   : > { %v855_v63 = vsub.f32 %v846_v44, %v854_v62 }
 0x36e   : > { %v856_v1 = vmul.f32 1.442695, %v855_v63 }
 0x370   : > { %1617 = vpow2.f32 %v856_v1 }
 0x372   : > { %v1616_v2 = vpop.eup %1615 }
 0x373   : > { %v966_v3 = vpop.xlane.xlu0 %965  ;;  %v745_v4 = vsel %vm579_vm2, %v1616_v2, 0.0 }
 0x374   : > { %v967_v5 = vsub.f32 %v958_v49, %v966_v3  ;;  %746 = vadd.xlane.f32.xlu0 %v745_v4 }
 0x376   : > { %v968_v6 = vmul.f32 1.442695, %v967_v5 }
 0x378   : > { %1619 = vpow2.f32 %v968_v6 }
 0x37a   : > { %v1618_v7 = vpop.eup %1617 }
 0x37b   : > { %v858_v8 = vsel %vm579_vm2, %v1618_v7, 0.0 }
 0x37c   : > { %859 = vadd.xlane.f32.xlu1 %v858_v8 }
 0x382   : > { %v1620_v9 = vpop.eup %1619 }
 0x383   : > { %v970_v10 = vsel %vm579_vm2, %v1620_v9, 0.0 }
 0x384   : > { %971 = vadd.xlane.f32.xlu0 %v970_v10 }
 0x38d   : > { %978 = vrot.lane.b32.xlu1 %v578_v34, %s1906_s18  ;;  %s1775_s18 = sshll.u32 %s1910_s9, 4  ;;  %s1776_s18 = int_to_ptr.vmem [resolvable:$false] %s1775_s18 }
 0x38e   : > { %s1777_s6 = scalar_lea.vmem %s1776_s18, 512  ;;  %p1778_p0 = scmp.lt.s32.totalorder %s2304_s13, %s1776_s18 }
 0x38f   : > { %v634_v11 = vpop.xlane.xlu1 %633 }
 0x390   : > { %1621 = vrcp.f32 %v634_v11 }
 0x393   : > { %v755_v13 = vpop.permute.xlu1 %754 }
 0x394   : > { %v760_v16 = vsel %vm643_vm3, %v755_v13, 0 }
 0x39a   : > { %v1622_v12 = vpop.eup %1621  ;;  %866 = vrot.lane.b32.xlu0 %v578_v34, %s1904_s8  ;;  %s1771_s8 = scalar_lea.vmem %s2304_s13, 256 }
 0x39b   : > { %v636_v14 = vmul.f32 %v1622_v12, %v1614_v57  ;;  %p1772_p2 = scmp.ne.s32.totalorder %s2304_s13, %s1771_s8  ;;  %p1779_p7 = scmp.lt.s32.totalorder %s1777_s6, %s1771_s8 }
 0x39d   : > { %v637_v15 = vpack.c.bf16 %v636_v14, %v636_v14  ;;  %p1773_p10 = pnand %p1772_p2, %p2419_p9  ;;  %p1780_p5 = por %p1779_p7, %p1778_p0 }
 0x39f   : > { %639 = vst.msk [vmem:[%s2270_s30] sm:$0xf] %vm638_vm4, %v637_v15  ;;  %1438 = vmatmul.mubr.msk.bf16.vlgmr.msra.gmra.mrb[8].mxu0 %vm579_vm2, %v637_v15  ;;  %p1774_p1 = pneg %p1773_p10 }
 0x3a0   : > { %1448 = vmatpush3.bf16.msra.mxu0 %v760_v16  ;;  %1449 = vmatprep.mubr.msk.bf16.mxu0 %vm1903_vm0, %v1902_v0 }
 0x3a1   : > { %1459 = vmatprep.subr.bf16.mxu0 %v1902_v0  ;;  %p1781_p8 = pnand %p1780_p5, %p1774_p1 }
 0x401   : > { %v747_v17 = vpop.xlane.xlu0 %746 }
 0x402   : > { %1623 = vrcp.f32 %v747_v17 }
 0x409   : > { %v860_v18 = vpop.xlane.xlu1 %859 }
 0x40a   : > { %1625 = vrcp.f32 %v860_v18 }
 0x40c   : > { %v1624_v19 = vpop.eup %1623 }
 0x40d   : > { %v749_v20 = vmul.f32 %v1624_v19, %v1616_v2  ;;  %v979_v27 = vpop.permute.xlu1 %978 }
 0x40e   : > { %v984_v29 = vsel %vm643_vm3, %v979_v27, 0 }
 0x40f   : > { %v750_v21 = vpack.c.bf16 %v749_v20, %v749_v20 }
 0x411   : > { %v972_v22 = vpop.xlane.xlu0 %971  ;;  %1357 = vst.msk [vmem:[%s2270_s30 + $0x4] sm:$0xf] %vm638_vm4, %v750_v21  ;;  %1450 = vmatmul.mubr.msk.bf16.vlgmr.msra.gmra.mrb[12].mxu0 %vm579_vm2, %v750_v21 }
 0x412   : > { %1627 = vrcp.f32 %v972_v22  ;;  %1461 = vmatprep.mubr.msk.bf16.mxu0 %vm1903_vm0, %v1902_v0 }
 0x414   : > { %v1626_v23 = vpop.eup %1625 }
 0x415   : > { %v862_v24 = vmul.f32 %v1626_v23, %v1618_v7  ;;  %v867_v25 = vpop.permute.xlu0 %866 }
 0x416   : > { %v872_v26 = vsel %vm643_vm3, %v867_v25, 0 }
 0x417   : > { %1460 = vmatpush3.bf16.msra.mxu0 %v872_v26  ;;  %v863_v28 = vpack.c.bf16 %v862_v24, %v862_v24 }
 0x418   : > { %1471 = vmatprep.subr.bf16.mxu0 %v1902_v0 }
 0x419   : > { %1360 = vst.msk [vmem:[%s2270_s30 + $0x8] sm:$0xf] %vm638_vm4, %v863_v28 }
 0x41a   : > { %1462 = vmatmul.mubr.msk.bf16.vlgmr.msra.gmra.mrb[16].mxu0 %vm579_vm2, %v863_v28 }
 0x41b   : > { %1472 = vmatpush3.bf16.msra.mxu0 %v984_v29  ;;  %1473 = vmatprep.mubr.msk.bf16.mxu0 %vm1903_vm0, %v1902_v0 }
 0x41c   : > { %v1628_v30 = vpop.eup %1627 }
 0x41d   : > { %v974_v31 = vmul.f32 %v1628_v30, %v1620_v9 }
 0x41f   : > { %v975_v32 = vpack.c.bf16 %v974_v31, %v974_v31 }
 0x421   : > { %1363 = vst.msk [vmem:[%s2270_s30 + $0xc] sm:$0xf] %vm638_vm4, %v975_v32 }
 0x422   : > { %1474 = vmatmul.mubr.msk.bf16.vlgmr.msra.gmra.mrb[20].mxu0 %vm579_vm2, %v975_v32 }
 0x472   : > { %v681_v33 = vpop.f32.mrb[8].mxu0 }
 0x473   : > { %v1439_v34 = vpop.f32.mrb[9].mxu0 }
 0x474   : > { %v684_v35 = vpop.f32.mrb[10].mxu0 }
 0x475   : > { %v1440_v36 = vpop.f32.mrb[11].mxu0 }
 0x4e4   : > { %v796_v38 = vpop.f32.mrb[12].mxu0 }
 0x4e5   : > { %1027 = vrot.lane.b32.xlu1 %v796_v38, %s1907_s15  ;;  %v1451_v39 = vpop.f32.mrb[13].mxu0 }
 0x4e6   : > { %v799_v40 = vpop.f32.mrb[14].mxu0 }
 0x4e7   : > { %v1452_v41 = vpop.f32.mrb[15].mxu0 }
 0x4ed   : > { %v908_v43 = vpop.f32.mrb[16].mxu0 }
 0x4ee   : > { %1031 = vrot.lane.b32.xlu0 %v908_v43, %s1908_s17  ;;  %v1463_v44 = vpop.f32.mrb[17].mxu0 }
 0x4ef   : > { %v911_v45 = vpop.f32.mrb[18].mxu0 }
 0x4f0   : > { %v1464_v46 = vpop.f32.mrb[19].mxu0 }
 0x4f5   : > { %v1020_v47 = vpop.f32.mrb[20].mxu0 }
 0x4f6   : > { %1035 = vrot.lane.b32.xlu1 %v1020_v47, %s1909_s10  ;;  %v1475_v48 = vpop.f32.mrb[21].mxu0 }
 0x4f7   : > { %v1023_v0 = vpop.f32.mrb[22].mxu0 }
 0x4f8   : > { %v1476_v49 = vpop.f32.mrb[23].mxu0 }
 0x557   : > { %v1028_v50 = vpop.permute.xlu1 %1027 }
 0x558   : > { %v1038_v52 = vsel %vm579_vm2, %v681_v33, %v1028_v50 }
 0x560   : > { %v1032_v51 = vpop.permute.xlu0 %1031 }
 0x561   : > { %v1040_v53 = vsel %vm1039_vm5, %v1038_v52, %v1032_v51 }
 0x568   : > { %v1036_v54 = vpop.permute.xlu1 %1035 }
 0x569   : > { %v1042_v55 = vsel %vm1041_vm6, %v1040_v53, %v1036_v54 }
 0x56a   : > { %v1043_v56 = vpack.c.bf16 %v1042_v55, %v1042_v55 }
 0x56c   : > { %1482 = vmatmul.mubr.msk.bf16.vlgmr.msra.gmra.mrb[20].mxu1 %vm428_vm1, %v1043_v56 }
 0x56d   : > { %1784 = shalt.err (!%p1781_p8)
}
 0x56e   : > { %s1785_s30 = scalar_lea.hbm %s2302_s16, 256  ;;  %s1789_s10 = scalar_lea.hbm %s2396_s7, 512 }
 0x56f   : > { %p1786_p3 = scmp.ne.s32.totalorder %s2302_s16, %s1785_s30  ;;  %p1790_p13 = scmp.lt.u32.totalorder %s2302_s16, %s2396_s7 }
 0x570   : > { %p1791_p12 = scmp.lt.u32.totalorder %s1789_s10, %s1785_s30  ;;  %p1793_p2 = scmp.lt.u32.totalorder %s1785_s30, %s2302_s16 }
 0x571   : > { %p1787_p11 = pnand %p1786_p3, %p2419_p9 }
 0x572   : > { %p1792_p4 = por %p1791_p12, %p1790_p13 }
 0x573   : > { %p1788_p6 = pneg %p1787_p11 }
 0x574   : > { %p1794_p10 = por %p1793_p2, %p1792_p4 }
 0x576   : > { %p1795_p1 = pnand %p1794_p10, %p1788_p6 }
 0x578   : > { %1798 = shalt.err (!%p1795_p1)
}
 0x579   : > { %s1911_s19 = smov 64   ;;  %s1912_s8 = smov 4   ;;  %v1368_v57 = vld [vmem:[%s2394_s5] ss:$0 sm:$0xff] }
 0x57a   : > { %1504 = dma.vmem_to_hbm [thread:$0]  (%p2419_p9), %s2304_s13, 256, %s2302_s16, %s1130_s14, %s1911_s19, %s1911_s19, %s1912_s8  }
 0x57b   : > { %s1343_s6 = sshll.u32 %s2192_s1, 3  ;;  %s1371_s30 = sshll.u32 %s1885_s27, 7 }
 0x57c   : > { %s380_s15 = scalar_lea.vmem [#allocation12], %s1343_s6  ;;  %s2420_s13 = sld [smem:[#allocation21_spill]] }
 0x57d   : > { %s1144_s17 = sshll.u32 %s380_s15, 4  ;;  %s1125_s14 = scalar_lea.sflag [#allocation5], %s2192_s1  ;;  %s2341_s17 = int_to_ptr.vmem [resolvable:$true] %s1144_s17 }
 0x57e   : > { %s1799_s11 = scalar_lea.vmem %s2341_s17, 128  ;;  %s1913_s27 = smov [#allocation12]  }
 0x57f   : > { %p1800_p0 = scmp.ne.s32.totalorder %s2341_s17, %s1799_s11  ;;  %s1803_s19 = sshll.u32 %s1913_s27, 4  ;;  %s1804_s19 = int_to_ptr.vmem [resolvable:$false] %s1803_s19 }
 0x580   : > { %s1805_s8 = scalar_lea.vmem %s1804_s19, 256  ;;  %p1806_p8 = scmp.lt.s32.totalorder %s2341_s17, %s1804_s19 }
 0x581   : > { %p1801_p7 = pnand %p1800_p0, %p2419_p9  ;;  %p1807_p3 = scmp.lt.s32.totalorder %s1805_s8, %s1799_s11 }
 0x582   : > { %s2339_s16 = scalar_lea.hbm %s2420_s13, %s1371_s30 }
 0x583   : > { %p1802_p5 = pneg %p1801_p7  ;;  %p1808_p11 = por %p1807_p3, %p1806_p8 }
 0x585   : > { %p1809_p6 = pnand %p1808_p11, %p1802_p5 }
 0x63f   : > { %v1093_v58 = vpop.f32.mrb[20].mxu1 }
 0x640   : > { %v1110_v59 = vadd.f32 %v1368_v57, %v1093_v58  ;;  %v1483_v60 = vpop.f32.mrb[21].mxu1 }
 0x641   : > { %v1096_v61 = vpop.f32.mrb[22].mxu1 }
 0x642   : > { %1111 = vst.msk [vmem:[#allocation2] sm:$0xff] %vm428_vm1, %v1110_v59  ;;  %v1484_v62 = vpop.f32.mrb[23].mxu1 }
 0x649   : > { %v1122_v63 = vld [vmem:[#allocation2] sm:$0xff] }
 0x64a   : > { %1123 = vst.msk [vmem:[%s380_s15] sm:$0xff] %vm428_vm1, %v1122_v63 }
 0x64b   : > { %1812 = shalt.err (!%p1809_p6)
}
 0x64c   : > { %s1813_s1 = scalar_lea.hbm %s2339_s16, 128  ;;  %s1817_s6 = scalar_lea.hbm %s2420_s13, 256 }
 0x64d   : > { %p1814_p13 = scmp.ne.s32.totalorder %s2339_s16, %s1813_s1  ;;  %p1818_p2 = scmp.lt.u32.totalorder %s2339_s16, %s2420_s13 }
 0x64e   : > { %p1819_p10 = scmp.lt.u32.totalorder %s1817_s6, %s1813_s1  ;;  %p1821_p0 = scmp.lt.u32.totalorder %s1813_s1, %s2339_s16 }
 0x64f   : > { %p1815_p12 = pnand %p1814_p13, %p2419_p9 }
 0x650   : > { %p1820_p1 = por %p1819_p10, %p1818_p2 }
 0x651   : > { %p1816_p4 = pneg %p1815_p12 }
 0x652   : > { %p1822_p7 = por %p1821_p0, %p1820_p1 }
 0x654   : > { %p1823_p5 = pnand %p1822_p7, %p1816_p4 }
 0x656   : > { %1826 = shalt.err (!%p1823_p5)
}
 0x657   : > { %1503 = dma.vmem_to_hbm [thread:$0]  (%p2419_p9), %s2341_s17, 128, %s2339_s16, %s1125_s14  }
 0x658 PF: > { %s1175_s10 = sand.u32 1, %s1873_s24   ;;  %p2421_p8 = scmp.ne.s32.totalorder %s2415_s23, 0 }
 0x659   : > { %p2422_p3 = scmp.ge.s32.totalorder %s1893_s29, 2  ;;  %s1176_s12 = scalar_lea.sflag [#allocation5], %s1175_s10 }
 0x65b   : > { %p1525_p11 = pnand %p2422_p3, %p2421_p8 }
 0x65d   : > { %1864 = dma.done.wait (!%p1525_p11), %s1176_s12, 128  }
 0x65e   : > { %1866 = vsyncadd (!%p1525_p11), %s1176_s12, 4294967168  ;;  %s1185_s11 = scalar_lea.sflag [#allocation14], %s1175_s10 }
 0x65f   : > { %1868 = dma.done.wait (!%p1525_p11), %s1185_s11, 256  }
 0x660   : > { %1870 = vsyncadd (!%p1525_p11), %s1185_s11, 4294967040  ;;  %s29_s29 = sadd.s32 1, %s1893_s29   ;;  %s2423_s24 = smov %s1877_s25 }
 0x661   : > { %p26_p6 = scmp.ge.s32.totalorder %s29_s29, 4   ;;  %s2424_s25 = smov %s1881_s26 }
 0x662   : > { %s2425_s26 = smov %s2142_s21  ;;  %s2426_s27 = smov %s1889_s28 }
 0x663   : > { %s2427_s28 = smov %s2429_s22  ;;  %28 = sbr.rel (!%p26_p6) target bundleno = 13 (0xd), region = 141 }
 0x66a   :  { %1190 = vsyncpa [#allocation4], 1 }
 0x66b   :  { %1192 = vsyncpa [#allocation4 + $0x1], 1 }
 0x66c   :  { %1193 = vsyncpa [#allocation7], 1 }
 0x66d   :  { %1194 = vsyncpa [#allocation10], 1 }
 0x66e   :  { %1195 = vsyncpa [#allocation5], 1 }
 0x66f   :  { %1197 = vsyncpa [#allocation5 + $0x1], 1 }
 0x670   :  { %1198 = vsyncpa [#allocation14], 1 }
 0x671   :  { %1200 = vsyncpa [#allocation14 + $0x1], 1 }

</bundles_post_ra>
